<compile_context>
chip_gen: v5e
topology: v5e:2x2
jax: 0.10.0
libtpu: 0.0.40
codegen_flags: <defaults>
</compile_context>

<pallas_src>
import functools

import jax
import jax.numpy as jnp
from jax import lax
from jax.experimental import pallas as pl
from jax.experimental.pallas import tpu as pltpu


def _is_pow2(n: int) -> bool:
    return n > 0 and (n & (n - 1)) == 0


def repconv_kernel(x_ref, w1_ref, dwk_ref, w2_ref, bias_ref, o_ref, *, H, W):
    """Fused RepConv on a lane-dense (channels, pixels) tile.

    x_ref:    (C, P)   input pixels, P = images_per_block * H * W (flattened n,i,j)
    w1_ref:   (C, C)   1x1 conv with BN1 scale folded in
    dwk_ref:  (C, 9)   depthwise 3x3 taps, k = 3*dh + dw
    w2_ref:   (Co, C)  1x1 conv with BN2 scale folded in
    bias_ref: (Co, 1)  merged bias: b2 + w2s @ (b1 * sum(dwk))
    """
    C, P = x_ref.shape

    # --- 1x1 conv + folded BN1 scale on the MXU (BN1 shift lives in the merged bias) ---
    y1 = jnp.dot(w1_ref[...], x_ref[...], preferred_element_type=jnp.float32)   # (C, P)

    # --- per-pixel row / column inside its image, from the flat pixel index ---
    pidx = lax.broadcasted_iota(jnp.int32, (1, P), 1)
    if _is_pow2(W) and _is_pow2(H):
        col = pidx & (W - 1)
        row = (pidx >> (W - 1).bit_length()) & (H - 1)
    else:
        col = pidx % W
        row = (pidx // W) % H

    hmask = {-1: row >= 1, 0: None, 1: row < H - 1}
    wmask = {-1: col >= 1, 0: None, 1: col < W - 1}

    # --- depthwise 3x3 via XLU rolls along the flat pixel axis + zero border masks ---
    dwk = dwk_ref[...]                                       # (C, 9)
    z = jnp.zeros((C, P), jnp.float32)
    for dh in range(3):
        sh = dh - 1
        mh = hmask[sh]
        for dw in range(3):
            sw = dw - 1
            mw = wmask[sw]
            d = sh * W + sw                                  # flat-pixel offset of this tap
            shifted = pltpu.roll(y1, (-d) % P, 1) if d != 0 else y1
            if mh is None and mw is None:
                tap = shifted
            else:
                m = mh if mw is None else (mw if mh is None else jnp.logical_and(mh, mw))
                tap = jnp.where(m, shifted, 0.0)             # out-of-range taps read zero pad
            k = dh * 3 + dw
            z = z + dwk[:, k:k + 1] * tap

    # --- 1x1 conv (C -> Co) + folded BN2 scale on the MXU, plus merged bias ---
    o_ref[...] = (jnp.dot(w2_ref[...], z, preferred_element_type=jnp.float32)
                  + bias_ref[...]).astype(o_ref.dtype)


def repconv_pallas(x, params, eps=1e-5, max_block_bytes=4 * 1024 * 1024):
    w1, g1, be1, rm1, rv1, dwk, w2, g2, be2, rm2, rv2 = params
    N, C, H, W = x.shape
    Co = w2.shape[0]
    HW = H * W

    # Fold inference-mode BN scales into the 1x1 conv weights.
    s1 = g1 / jnp.sqrt(rv1 + eps)
    b1 = be1 - rm1 * s1                                      # == BNAndPadLayer pad value == BN1(0)
    s2 = g2 / jnp.sqrt(rv2 + eps)
    b2 = be2 - rm2 * s2
    w1s = (s1[:, None] * w1).astype(jnp.float32)             # (C, C)
    w2s = (s2[:, None] * w2).astype(jnp.float32)             # (Co, C)
    dwk9 = dwk.reshape(C, 9).astype(jnp.float32)             # (C, 9), k = 3*dh + dw

    # The constant BN1 shift passes through every depthwise tap and the second 1x1 conv;
    # fold it, together with the BN2 shift, into a single per-output-channel bias.
    ksum = dwk9.sum(axis=1)                                  # (C,)
    bias_out = (b2 + w2s @ (b1 * ksum)).reshape(Co, 1).astype(jnp.float32)

    # Lane-dense layout: channels on sublanes, batch*H*W pixels on lanes.
    x_flat = jnp.transpose(x, (1, 0, 2, 3)).reshape(C, N * HW).astype(jnp.float32)

    # Images per grid step: largest block within a conservative VMEM budget whose lane
    # extent is a multiple of 128 (or the full pixel dim, which is always legal).
    per_image = (C + Co) * HW * 4
    nb = max(1, min(N, max_block_bytes // max(1, per_image)))
    while N % nb:
        nb -= 1
    if (nb * HW) % 128 != 0:
        nb = N
    pb = nb * HW
    grid = (N // nb,)

    kernel = functools.partial(repconv_kernel, H=H, W=W)
    out_flat = pl.pallas_call(
        kernel,
        out_shape=jax.ShapeDtypeStruct((Co, N * HW), jnp.float32),
        grid_spec=pltpu.PrefetchScalarGridSpec(
            num_scalar_prefetch=0,
            grid=grid,
            in_specs=[
                pl.BlockSpec((C, pb), lambda i: (0, i)),     # activations
                pl.BlockSpec((C, C), lambda i: (0, 0)),      # w1 * s1
                pl.BlockSpec((C, 9), lambda i: (0, 0)),      # depthwise 3x3 taps
                pl.BlockSpec((Co, C), lambda i: (0, 0)),     # w2 * s2
                pl.BlockSpec((Co, 1), lambda i: (0, 0)),     # merged bias
            ],
            out_specs=pl.BlockSpec((Co, pb), lambda i: (0, i)),
        ),
        compiler_params=pltpu.CompilerParams(
            dimension_semantics=("parallel",)),
    )(x_flat, w1s, dwk9, w2s, bias_out)

    return out_flat.reshape(Co, N, H, W).transpose(1, 0, 2, 3)


def repconv_ref(x, params, eps=1e-5):
    # Pure-JAX reference (same inference-mode semantics) for validation.
    w1, g1, be1, rm1, rv1, dwk, w2, g2, be2, rm2, rv2 = params
    N, C, H, W = x.shape
    hp = jax.lax.Precision.HIGHEST
    s1 = g1 / jnp.sqrt(rv1 + eps)
    b1 = be1 - rm1 * s1
    y = jnp.einsum('oc,nchw->nohw', w1, x, precision=hp)
    y = y * s1[None, :, None, None] + b1[None, :, None, None]
    pad = jnp.broadcast_to(b1[None, :, None, None], (N, C, H + 2, W + 2))
    pad = pad.at[:, :, 1:H + 1, 1:W + 1].set(y)
    z = jnp.zeros((N, C, H, W), jnp.float32)
    for dh in range(3):
        for dw in range(3):
            z = z + dwk[:, dh, dw][None, :, None, None] * pad[:, :, dh:dh + H, dw:dw + W]
    out = jnp.einsum('oc,nchw->nohw', w2, z, precision=hp)
    s2 = g2 / jnp.sqrt(rv2 + eps)
    b2 = be2 - rm2 * s2
    return out * s2[None, :, None, None] + b2[None, :, None, None]


if __name__ == "__main__":
    N, C, Co, H, W = 2, 8, 16, 16, 16
    key = jax.random.PRNGKey(0)
    ks = jax.random.split(key, 12)

    # Deterministic synthetic parameters (shapes follow RepConv(in_channel=8, out_channel=16)).
    w1 = 0.3 * jax.random.normal(ks[0], (C, C), jnp.float32)          # 1x1 conv C->C
    dwk = 0.3 * jax.random.normal(ks[1], (C, 3, 3), jnp.float32)      # depthwise 3x3
    w2 = 0.3 * jax.random.normal(ks[2], (Co, C), jnp.float32)         # 1x1 conv C->Co
    g1 = 1.0 + 0.1 * jax.random.normal(ks[3], (C,), jnp.float32)      # BN1 gamma
    be1 = 0.1 * jax.random.normal(ks[4], (C,), jnp.float32)           # BN1 beta
    rm1 = 0.1 * jax.random.normal(ks[5], (C,), jnp.float32)           # BN1 running_mean
    rv1 = 0.5 + jnp.abs(jax.random.normal(ks[6], (C,), jnp.float32))  # BN1 running_var
    g2 = 1.0 + 0.1 * jax.random.normal(ks[7], (Co,), jnp.float32)
    be2 = 0.1 * jax.random.normal(ks[8], (Co,), jnp.float32)
    rm2 = 0.1 * jax.random.normal(ks[9], (Co,), jnp.float32)
    rv2 = 0.5 + jnp.abs(jax.random.normal(ks[10], (Co,), jnp.float32))
    params = (w1, g1, be1, rm1, rv1, dwk, w2, g2, be2, rm2, rv2)

    x = jax.random.normal(ks[11], (N, C, H, W), jnp.float32)

    out = jax.block_until_ready(repconv_pallas(x, params))
    ref = repconv_ref(x, params)

    assert out.shape == (N, Co, H, W)
    max_err = float(jnp.max(jnp.abs(out - ref)))
    assert jnp.allclose(out, ref, rtol=1e-2, atol=1e-2), max_err
    print("KERNEL_OK")
</pallas_src>

<mosaic_0001>
module attributes {stable_mosaic.version = 11 : i64} {
  func.func @repconv_kernel(%arg0: i32, %arg1: memref<8x512xf32, #tpu.memory_space<vmem>>, %arg2: memref<8x8xf32, #tpu.memory_space<vmem>>, %arg3: memref<8x9xf32, #tpu.memory_space<vmem>>, %arg4: memref<16x8xf32, #tpu.memory_space<vmem>>, %arg5: memref<16x1xf32, #tpu.memory_space<vmem>>, %arg6: memref<16x512xf32, #tpu.memory_space<vmem>>) attributes {dimension_semantics = [#tpu.dimension_semantics<parallel>], iteration_bounds = array<i64: 1>, scalar_prefetch = 0 : i64, scratch_operands = 0 : i64, tpu.core_type = #tpu.core_type<tc>, window_params = [{transform_indices = @transform_0, window_bounds = array<i64: 8, 512>}, {pipeline_mode = #tpu.pipeline_mode<synchronous>, transform_indices = @transform_1, window_bounds = array<i64: 8, 8>}, {pipeline_mode = #tpu.pipeline_mode<synchronous>, transform_indices = @transform_2, window_bounds = array<i64: 8, 9>}, {pipeline_mode = #tpu.pipeline_mode<synchronous>, transform_indices = @transform_3, window_bounds = array<i64: 16, 8>}, {pipeline_mode = #tpu.pipeline_mode<synchronous>, transform_indices = @transform_4, window_bounds = array<i64: 16, 1>}, {transform_indices = @transform_5, window_bounds = array<i64: 16, 512>}]} {
    %c0 = arith.constant 0 : index
    %c0_0 = arith.constant 0 : index
    %0 = vector.load %arg2[%c0, %c0_0] : memref<8x8xf32, #tpu.memory_space<vmem>>, vector<8x8xf32>
    %c0_1 = arith.constant 0 : index
    %c0_2 = arith.constant 0 : index
    %1 = vector.load %arg1[%c0_1, %c0_2] : memref<8x512xf32, #tpu.memory_space<vmem>>, vector<8x512xf32>
    %cst = arith.constant dense<0.000000e+00> : vector<8x512xf32>
    %2 = tpu.matmul %0, %1, %cst {dimension_numbers = #tpu.dot_dimension_numbers<[1], [0], [0], [1], [0, 0, 1, 1], [], []>} : vector<8x8xf32>, vector<8x512xf32>, vector<8x512xf32> -> vector<8x512xf32>
    %3 = tpu.iota {dimensions = array<i32: 1>} : vector<1x512xi32>
    %c15_i32 = arith.constant 15 : i32
    %4 = vector.broadcast %c15_i32 : i32 to vector<1x512xi32>
    %5 = arith.andi %3, %4 : vector<1x512xi32>
    %c4_i32 = arith.constant 4 : i32
    %6 = vector.broadcast %c4_i32 : i32 to vector<1x512xi32>
    %7 = arith.shrsi %3, %6 : vector<1x512xi32>
    %c15_i32_3 = arith.constant 15 : i32
    %8 = vector.broadcast %c15_i32_3 : i32 to vector<1x512xi32>
    %9 = arith.andi %7, %8 : vector<1x512xi32>
    %c1_i32 = arith.constant 1 : i32
    %10 = vector.broadcast %c1_i32 : i32 to vector<1x512xi32>
    %11 = arith.cmpi sge, %9, %10 : vector<1x512xi32>
    %c15_i32_4 = arith.constant 15 : i32
    %12 = vector.broadcast %c15_i32_4 : i32 to vector<1x512xi32>
    %13 = arith.cmpi slt, %9, %12 : vector<1x512xi32>
    %c1_i32_5 = arith.constant 1 : i32
    %14 = vector.broadcast %c1_i32_5 : i32 to vector<1x512xi32>
    %15 = arith.cmpi sge, %5, %14 : vector<1x512xi32>
    %c15_i32_6 = arith.constant 15 : i32
    %16 = vector.broadcast %c15_i32_6 : i32 to vector<1x512xi32>
    %17 = arith.cmpi slt, %5, %16 : vector<1x512xi32>
    %c0_7 = arith.constant 0 : index
    %c0_8 = arith.constant 0 : index
    %18 = vector.load %arg3[%c0_7, %c0_8] : memref<8x9xf32, #tpu.memory_space<vmem>>, vector<8x9xf32>
    %cst_9 = arith.constant 0.000000e+00 : f32
    %19 = vector.broadcast %cst_9 : f32 to vector<8x512xf32>
    %c17_i32 = arith.constant 17 : i32
    %20 = tpu.dynamic_rotate %2 by %c17_i32 dim 1 : vector<8x512xf32>, i32 -> vector<8x512xf32>
    %21 = arith.andi %11, %15 : vector<1x512xi1>
    %cst_10 = arith.constant 0.000000e+00 : f32
    %22 = vector.shape_cast %21 : vector<1x512xi1> to vector<1x512xi1>
    %23 = vector.broadcast %22 : vector<1x512xi1> to vector<8x512xi1>
    %24 = vector.broadcast %cst_10 : f32 to vector<8x512xf32>
    %25 = arith.select %23, %20, %24 : vector<8x512xi1>, vector<8x512xf32>
    %26 = vector.extract_strided_slice %18 {offsets = [0, 0], sizes = [8, 1], strides = [1, 1]} : vector<8x9xf32> to vector<8x1xf32>
    %27 = vector.broadcast %26 : vector<8x1xf32> to vector<8x512xf32>
    %28 = arith.mulf %27, %25 : vector<8x512xf32>
    %29 = arith.addf %19, %28 : vector<8x512xf32>
    %c16_i32 = arith.constant 16 : i32
    %30 = tpu.dynamic_rotate %2 by %c16_i32 dim 1 : vector<8x512xf32>, i32 -> vector<8x512xf32>
    %cst_11 = arith.constant 0.000000e+00 : f32
    %31 = vector.shape_cast %11 : vector<1x512xi1> to vector<1x512xi1>
    %32 = vector.broadcast %31 : vector<1x512xi1> to vector<8x512xi1>
    %33 = vector.broadcast %cst_11 : f32 to vector<8x512xf32>
    %34 = arith.select %32, %30, %33 : vector<8x512xi1>, vector<8x512xf32>
    %35 = vector.extract_strided_slice %18 {offsets = [0, 1], sizes = [8, 1], strides = [1, 1]} : vector<8x9xf32> to vector<8x1xf32>
    %36 = vector.broadcast %35 : vector<8x1xf32> to vector<8x512xf32>
    %37 = arith.mulf %36, %34 : vector<8x512xf32>
    %38 = arith.addf %29, %37 : vector<8x512xf32>
    %c15_i32_12 = arith.constant 15 : i32
    %39 = tpu.dynamic_rotate %2 by %c15_i32_12 dim 1 : vector<8x512xf32>, i32 -> vector<8x512xf32>
    %40 = arith.andi %11, %17 : vector<1x512xi1>
    %cst_13 = arith.constant 0.000000e+00 : f32
    %41 = vector.shape_cast %40 : vector<1x512xi1> to vector<1x512xi1>
    %42 = vector.broadcast %41 : vector<1x512xi1> to vector<8x512xi1>
    %43 = vector.broadcast %cst_13 : f32 to vector<8x512xf32>
    %44 = arith.select %42, %39, %43 : vector<8x512xi1>, vector<8x512xf32>
    %45 = vector.extract_strided_slice %18 {offsets = [0, 2], sizes = [8, 1], strides = [1, 1]} : vector<8x9xf32> to vector<8x1xf32>
    %46 = vector.broadcast %45 : vector<8x1xf32> to vector<8x512xf32>
    %47 = arith.mulf %46, %44 : vector<8x512xf32>
    %48 = arith.addf %38, %47 : vector<8x512xf32>
    %c1_i32_14 = arith.constant 1 : i32
    %49 = tpu.dynamic_rotate %2 by %c1_i32_14 dim 1 : vector<8x512xf32>, i32 -> vector<8x512xf32>
    %cst_15 = arith.constant 0.000000e+00 : f32
    %50 = vector.shape_cast %15 : vector<1x512xi1> to vector<1x512xi1>
    %51 = vector.broadcast %50 : vector<1x512xi1> to vector<8x512xi1>
    %52 = vector.broadcast %cst_15 : f32 to vector<8x512xf32>
    %53 = arith.select %51, %49, %52 : vector<8x512xi1>, vector<8x512xf32>
    %54 = vector.extract_strided_slice %18 {offsets = [0, 3], sizes = [8, 1], strides = [1, 1]} : vector<8x9xf32> to vector<8x1xf32>
    %55 = vector.broadcast %54 : vector<8x1xf32> to vector<8x512xf32>
    %56 = arith.mulf %55, %53 : vector<8x512xf32>
    %57 = arith.addf %48, %56 : vector<8x512xf32>
    %58 = vector.extract_strided_slice %18 {offsets = [0, 4], sizes = [8, 1], strides = [1, 1]} : vector<8x9xf32> to vector<8x1xf32>
    %59 = vector.broadcast %58 : vector<8x1xf32> to vector<8x512xf32>
    %60 = arith.mulf %59, %2 : vector<8x512xf32>
    %61 = arith.addf %57, %60 : vector<8x512xf32>
    %c511_i32 = arith.constant 511 : i32
    %62 = tpu.dynamic_rotate %2 by %c511_i32 dim 1 : vector<8x512xf32>, i32 -> vector<8x512xf32>
    %cst_16 = arith.constant 0.000000e+00 : f32
    %63 = vector.shape_cast %17 : vector<1x512xi1> to vector<1x512xi1>
    %64 = vector.broadcast %63 : vector<1x512xi1> to vector<8x512xi1>
    %65 = vector.broadcast %cst_16 : f32 to vector<8x512xf32>
    %66 = arith.select %64, %62, %65 : vector<8x512xi1>, vector<8x512xf32>
    %67 = vector.extract_strided_slice %18 {offsets = [0, 5], sizes = [8, 1], strides = [1, 1]} : vector<8x9xf32> to vector<8x1xf32>
    %68 = vector.broadcast %67 : vector<8x1xf32> to vector<8x512xf32>
    %69 = arith.mulf %68, %66 : vector<8x512xf32>
    %70 = arith.addf %61, %69 : vector<8x512xf32>
    %c497_i32 = arith.constant 497 : i32
    %71 = tpu.dynamic_rotate %2 by %c497_i32 dim 1 : vector<8x512xf32>, i32 -> vector<8x512xf32>
    %72 = arith.andi %13, %15 : vector<1x512xi1>
    %cst_17 = arith.constant 0.000000e+00 : f32
    %73 = vector.shape_cast %72 : vector<1x512xi1> to vector<1x512xi1>
    %74 = vector.broadcast %73 : vector<1x512xi1> to vector<8x512xi1>
    %75 = vector.broadcast %cst_17 : f32 to vector<8x512xf32>
    %76 = arith.select %74, %71, %75 : vector<8x512xi1>, vector<8x512xf32>
    %77 = vector.extract_strided_slice %18 {offsets = [0, 6], sizes = [8, 1], strides = [1, 1]} : vector<8x9xf32> to vector<8x1xf32>
    %78 = vector.broadcast %77 : vector<8x1xf32> to vector<8x512xf32>
    %79 = arith.mulf %78, %76 : vector<8x512xf32>
    %80 = arith.addf %70, %79 : vector<8x512xf32>
    %c496_i32 = arith.constant 496 : i32
    %81 = tpu.dynamic_rotate %2 by %c496_i32 dim 1 : vector<8x512xf32>, i32 -> vector<8x512xf32>
    %cst_18 = arith.constant 0.000000e+00 : f32
    %82 = vector.shape_cast %13 : vector<1x512xi1> to vector<1x512xi1>
    %83 = vector.broadcast %82 : vector<1x512xi1> to vector<8x512xi1>
    %84 = vector.broadcast %cst_18 : f32 to vector<8x512xf32>
    %85 = arith.select %83, %81, %84 : vector<8x512xi1>, vector<8x512xf32>
    %86 = vector.extract_strided_slice %18 {offsets = [0, 7], sizes = [8, 1], strides = [1, 1]} : vector<8x9xf32> to vector<8x1xf32>
    %87 = vector.broadcast %86 : vector<8x1xf32> to vector<8x512xf32>
    %88 = arith.mulf %87, %85 : vector<8x512xf32>
    %89 = arith.addf %80, %88 : vector<8x512xf32>
    %c495_i32 = arith.constant 495 : i32
    %90 = tpu.dynamic_rotate %2 by %c495_i32 dim 1 : vector<8x512xf32>, i32 -> vector<8x512xf32>
    %91 = arith.andi %13, %17 : vector<1x512xi1>
    %cst_19 = arith.constant 0.000000e+00 : f32
    %92 = vector.shape_cast %91 : vector<1x512xi1> to vector<1x512xi1>
    %93 = vector.broadcast %92 : vector<1x512xi1> to vector<8x512xi1>
    %94 = vector.broadcast %cst_19 : f32 to vector<8x512xf32>
    %95 = arith.select %93, %90, %94 : vector<8x512xi1>, vector<8x512xf32>
    %96 = vector.extract_strided_slice %18 {offsets = [0, 8], sizes = [8, 1], strides = [1, 1]} : vector<8x9xf32> to vector<8x1xf32>
    %97 = vector.broadcast %96 : vector<8x1xf32> to vector<8x512xf32>
    %98 = arith.mulf %97, %95 : vector<8x512xf32>
    %99 = arith.addf %89, %98 : vector<8x512xf32>
    %c0_20 = arith.constant 0 : index
    %c0_21 = arith.constant 0 : index
    %100 = vector.load %arg4[%c0_20, %c0_21] : memref<16x8xf32, #tpu.memory_space<vmem>>, vector<16x8xf32>
    %cst_22 = arith.constant dense<0.000000e+00> : vector<16x512xf32>
    %101 = tpu.matmul %100, %99, %cst_22 {dimension_numbers = #tpu.dot_dimension_numbers<[1], [0], [0], [1], [0, 0, 1, 1], [], []>} : vector<16x8xf32>, vector<8x512xf32>, vector<16x512xf32> -> vector<16x512xf32>
    %c0_23 = arith.constant 0 : index
    %c0_24 = arith.constant 0 : index
    %102 = vector.load %arg5[%c0_23, %c0_24] : memref<16x1xf32, #tpu.memory_space<vmem>>, vector<16x1xf32>
    %103 = vector.broadcast %102 : vector<16x1xf32> to vector<16x512xf32>
    %104 = arith.addf %101, %103 : vector<16x512xf32>
    %c0_25 = arith.constant 0 : index
    %c0_26 = arith.constant 0 : index
    %105 = vector.load %arg6[%c0_25, %c0_26] : memref<16x512xf32, #tpu.memory_space<vmem>>, vector<16x512xf32>
    tpu.vector_store %arg6[%c0_25, %c0_26], %104 {strides = array<i32>} : memref<16x512xf32, #tpu.memory_space<vmem>>, vector<16x512xf32>,
    return
  }
  func.func @transform_0(%arg0: i32) -> (i32, i32) {
    %c0_i32 = arith.constant 0 : i32
    %c0_i32_0 = arith.constant 0 : i32
    return %c0_i32, %arg0 : i32, i32
  }
  func.func @transform_1(%arg0: i32) -> (i32, i32) {
    %c0_i32 = arith.constant 0 : i32
    %c0_i32_0 = arith.constant 0 : i32
    %c0_i32_1 = arith.constant 0 : i32
    return %c0_i32, %c0_i32_0 : i32, i32
  }
  func.func @transform_2(%arg0: i32) -> (i32, i32) {
    %c0_i32 = arith.constant 0 : i32
    %c0_i32_0 = arith.constant 0 : i32
    %c0_i32_1 = arith.constant 0 : i32
    return %c0_i32, %c0_i32_0 : i32, i32
  }
  func.func @transform_3(%arg0: i32) -> (i32, i32) {
    %c0_i32 = arith.constant 0 : i32
    %c0_i32_0 = arith.constant 0 : i32
    %c0_i32_1 = arith.constant 0 : i32
    return %c0_i32, %c0_i32_0 : i32, i32
  }
  func.func @transform_4(%arg0: i32) -> (i32, i32) {
    %c0_i32 = arith.constant 0 : i32
    %c0_i32_0 = arith.constant 0 : i32
    %c0_i32_1 = arith.constant 0 : i32
    return %c0_i32, %c0_i32_0 : i32, i32
  }
  func.func @transform_5(%arg0: i32) -> (i32, i32) {
    %c0_i32 = arith.constant 0 : i32
    %c0_i32_0 = arith.constant 0 : i32
    return %c0_i32, %arg0 : i32, i32
  }
}

</mosaic_0001>

<bundles_post_ra>
// kernel: tpu_custom_call.1
= control target key start
LH: loop header
LB: loop body
LE: loop exit
PB: predicated region body
PF: predicated region fallthrough
CT: control target
= control target key end

     0   :  { %10 = vsyncpa [#allocation3], 0  ;;  %s1265_s0 = inlined_call_operand.vmem [shape: f32[8,512], index: 0, kind: input, shape index: {}]   ;;  %s1266_s1 = inlined_call_operand.vmem [shape: f32[8,8], index: 1, kind: input, shape index: {}]   ;;  %s1267_s2 = inlined_call_operand.hbm [shape: f32[8,9], index: 2, kind: input, shape index: {}]   ;;  %s1268_s3 = inlined_call_operand.vmem [shape: f32[16,8], index: 3, kind: input, shape index: {}]   ;;  %s1269_s4 = inlined_call_operand.vmem [shape: f32[16,1], index: 4, kind: input, shape index: {}]   ;;  %s1270_s5 = inlined_call_operand.hbm [shape: f32[16,512], index: 5, kind: output, shape index: {}]  }
   0x1   :  { %11 = vsyncpa [#allocation4], 0  ;;  %s21_s20 = sshll.u32 %s1267_s2, 4  ;;  %s719_s21 = smov [#allocation2]   ;;  %s22_s20 = int_to_ptr.hbm [resolvable:$true] %s21_s20 }
   0x2   :  { %s23_s22 = sshll.u32 %s719_s21, 4  ;;  %s24_s22 = int_to_ptr.vmem [resolvable:$true] %s23_s22 }
   0x3   :  { %26 = dma.hbm_to_vmem [thread:$0]  %s22_s20, 128, %s24_s22, [#allocation3]  }
   0x4   :  { %715 = dma.done.wait [#allocation3], 128  }
   0x5   :  { %716 = vsyncadd [#allocation3], 4294967168  ;;  %v720_v0 = vmov 0   ;;  %v721_v1 = vmov 1   ;;  %vm1271_vm0 = vcmask 64512   ;;  %v774_v2 = vld [vmem:[#allocation2] sm:$0xff]  ;;  %v124_v21 = vlaneseq }
   0x6   :  { %655 = vset.pattern.permute.xlu0 %v720_v0  ;;  %656 = vset.pattern.permute.xlu1 %v721_v1  ;;  %v37_v3 = vld [vmem:[%s1265_s0 + $0x8] sm:$0xff]  ;;  %v35_v4 = vld [vmem:[%s1266_s1] sm:$0xff]  ;;  %v38_v6 = vld [vmem:[%s1265_s0 + $0x10] sm:$0xff]  ;;  %v722_v8 = vmov 2   ;;  %v723_v9 = vmov 3   ;;  %v724_v10 = vmov 4  }
   0x7   :  { %189 = vperm.xlu0 %655, %v774_v2   ;;  %79 = vmatpush.msra.mxu1 %v37_v3  ;;  %v36_v5 = vld [vmem:[%s1265_s0] sm:$0xff]  ;;  %v39_v7 = vld [vmem:[%s1265_s0 + $0x18] sm:$0xff]  ;;  %v725_v11 = vmov 6   ;;  %v726_v12 = vmov 7   ;;  %v727_v13 = vmov 5   ;;  %s728_s0 = smov 15  }
   0x8   :  { %623 = vmatmul.msk.f32.vlgmr.msra.gmra.mxu1 %vm1271_vm0, %v35_v4  ;;  %59 = vmatpush.msra.mxu0 %v36_v5  ;;  %s729_s1 = smov 16   ;;  %s730_s7 = smov 17   ;;  %v736_v18 = vmov 8   ;;  %v873_v23 = vand.u32 127, %v124_v21 }
   0x9   :  { %622 = vmatmul.msk.f32.vlgmr.msra.gmra.mxu0 %vm1271_vm0, %v35_v4  ;;  %99 = vmatpush.msra.mxu2 %v38_v6  ;;  %s731_s8 = smov 1   ;;  %s732_s9 = smov 127  }
   0xa   :  { %119 = vmatpush.msra.mxu3 %v39_v7  ;;  %624 = vmatmul.msk.f32.vlgmr.msra.gmra.mxu2 %vm1271_vm0, %v35_v4  ;;  %s733_s10 = smov 112   ;;  %s734_s11 = smov 113   ;;  %v126_v26 = vadd.s32 128, %v873_v23  ;;  %vm245_vm3 = vcmp.lt.s32.totalorder %v873_v23, 15  ;;  %vm166_vm6 = vcmp.lt.s32.totalorder %v873_v23, 17  ;;  %vm286_vm8 = vcmp.lt.s32.totalorder %v873_v23, 1 }
   0xb   :  { %625 = vmatmul.msk.f32.vlgmr.msra.gmra.mxu3 %vm1271_vm0, %v35_v4  ;;  %226 = vperm.xlu1 %656, %v774_v2   ;;  %s735_s12 = smov 111   ;;  %vm208_vm9 = vcmp.lt.s32.totalorder %v873_v23, 16  ;;  %v127_v63 = vadd.s32 256, %v873_v23  ;;  %v133_v1 = vshra.s32 %v873_v23, 4  ;;  %v129_v7 = vand.u32 15, %v873_v23  ;;  %s609_s23 = sshll.u32 %s1270_s5, 4  ;;  %s610_s23 = int_to_ptr.hbm [resolvable:$true] %s609_s23 }
   0xc   :  { %661 = vset.pattern.permute.xlu2 %v725_v11  ;;  %v134_v28 = vshra.s32 %v126_v26, 4  ;;  %v130_v31 = vand.u32 15, %v126_v26  ;;  %s738_s24 = smov 512   ;;  %s739_s2 = smov 32  }
   0xd   :  { %394 = vperm.xlu2 %661, %v774_v2   ;;  %v135_v3 = vshra.s32 %v127_v63, 4  ;;  %v131_v6 = vand.u32 15, %v127_v63  ;;  %vm975_vm12 = vcmp.ge.s32.totalorder %v129_v7, 1 }
   0xe   :  { %v890_v32 = vand.u32 15, %v134_v28  ;;  %vm893_vm2 = vcmp.lt.s32.totalorder %v130_v31, 15  ;;  %vm917_vm5 = vcmp.ge.s32.totalorder %v130_v31, 1 }
   0xf   :  { %657 = vset.pattern.permute.xlu0 %v722_v8  ;;  %v966_v8 = vand.u32 15, %v133_v1  ;;  %vm971_vm11 = vcmp.ge.s32.totalorder %v131_v6, 1 }
  0x10   :  { %267 = vperm.xlu0 %657, %v774_v2   ;;  %vm142_vm1 = vcmp.ge.s32.totalorder %v890_v32, 1 }
  0x11   :  { %vm251_vm4 = vmand %vm142_vm1, %vm893_vm2  ;;  %vm141_vm10 = vcmp.ge.s32.totalorder %v966_v8, 1 }
  0x12   :  { %vm172_vm7 = vmand %vm142_vm1, %vm917_vm5 }
  0x13   :  { %658 = vset.pattern.permute.xlu1 %v723_v9  ;;  %v968_v9 = vand.u32 15, %v135_v3  ;;  %vm984_vm14 = vmand %vm141_vm10, %vm975_vm12 }
  0x14   :  { %304 = vperm.xlu1 %658, %v774_v2  }
  0x15   :  { %665 = vset.pattern.permute.xlu2 %v720_v0  ;;  %vm143_vm13 = vcmp.ge.s32.totalorder %v968_v9, 1 }
  0x16   :  { %vm173_vm15 = vmand %vm143_vm13, %vm971_vm11 }
  0x18   :  { %659 = vset.pattern.permute.xlu0 %v724_v10 }
  0x19   :  { %316 = vperm.xlu0 %659, %v774_v2  }
  0x1c   :  { %662 = vset.pattern.permute.xlu1 %v726_v12 }
  0x1d   :  { %431 = vperm.xlu1 %662, %v774_v2  }
  0x21   :  { %660 = vset.pattern.permute.xlu0 %v727_v13 }
  0x22   :  { %353 = vperm.xlu0 %660, %v774_v2  }
  0x25   :  { %664 = vset.pattern.permute.xlu1 %v720_v0 }
  0x2a   :  { %663 = vset.pattern.permute.xlu0 %v736_v18 }
  0x67   :  { %v869_v20 = vpop.permute.xlu2 %394 }
  0x79   :  { %v863_v19 = vpop.permute.xlu0 %189 }
  0x7d   :  { %v871_v22 = vpop.permute.xlu1 %226 }
  0x82   :  { %v875_v24 = vpop.permute.xlu0 %267 }
  0x85   :  { %v805_v14 = vpop.f32.mrf.mxu1 }
  0x86   :  { %239 = vrot.lane.b32.xlu2 %v805_v14, %s728_s0  ;;  %202 = vrot.lane.b32.xlu1 %v805_v14, %s729_s1  ;;  %v812_v15 = vpop.f32.mrf.mxu0  ;;  %v884_v27 = vpop.permute.xlu1 %304 }
  0x87   :  { %160 = vrot.lane.b32.xlu0 %v805_v14, %s730_s7 }
  0x8b   :  { %v888_v29 = vpop.permute.xlu0 %316 }
  0x8c   :  { %v320_v61 = vmul.f32 %v888_v29, %v805_v14  ;;  %v319_v11 = vmul.f32 %v888_v29, %v812_v15 }
  0x8d   :  { %v833_v17 = vpop.f32.mrf.mxu2 }
  0x8e   :  { %280 = vrot.lane.b32.xlu1 %v805_v14, %s731_s8  ;;  %158 = vrot.lane.b32.xlu2 %v812_v15, %s730_s7  ;;  %v831_v16 = vpop.f32.mrf.mxu3 }
  0x8f   :  { %200 = vrot.lane.b32.xlu0 %v812_v15, %s729_s1  ;;  %v899_v34 = vpop.permute.xlu1 %431 }
  0x94   :  { %v902_v35 = vpop.permute.xlu0 %353 }
  0x96   :  { %327 = vrot.lane.b32.xlu1 %v812_v15, %s732_s9  ;;  %237 = vrot.lane.b32.xlu2 %v812_v15, %s728_s0 }
  0x97   :  { %405 = vrot.lane.b32.xlu0 %v812_v15, %s733_s10 }
  0x9e   :  { %364 = vrot.lane.b32.xlu1 %v812_v15, %s734_s11  ;;  %278 = vrot.lane.b32.xlu2 %v812_v15, %s731_s8 }
  0x9f   :  { %329 = vrot.lane.b32.xlu0 %v805_v14, %s732_s9 }
  0xa6   :  { %164 = vrot.lane.b32.xlu1 %v831_v16, %s730_s7  ;;  %442 = vrot.lane.b32.xlu2 %v812_v15, %s735_s12  ;;  %v486_v15 = vld [vmem:[%s1269_s4 + $0x8] sm:$0xff] }
  0xa7   :  { %162 = vrot.lane.b32.xlu0 %v833_v17, %s730_s7 }
  0xae   :  { %241 = vrot.lane.b32.xlu1 %v833_v17, %s728_s0  ;;  %366 = vrot.lane.b32.xlu2 %v805_v14, %s734_s11 }
  0xaf   :  { %446 = vrot.lane.b32.xlu0 %v833_v17, %s735_s12 }
  0xb6   :  { %284 = vrot.lane.b32.xlu1 %v831_v16, %s731_s8  ;;  %204 = vrot.lane.b32.xlu2 %v833_v17, %s729_s1 }
  0xb7   :  { %472 = vperm.xlu0 %663, %v774_v2  }
  0xbe   :  { %333 = vrot.lane.b32.xlu1 %v831_v16, %s732_s9  ;;  %206 = vrot.lane.b32.xlu2 %v831_v16, %s729_s1 }
  0xbf   :  { %666 = vset.pattern.permute.xlu0 %v720_v0 }
  0xc6   :  { %370 = vrot.lane.b32.xlu1 %v831_v16, %s734_s11  ;;  %243 = vrot.lane.b32.xlu2 %v831_v16, %s728_s0 }
  0xce   :  { %409 = vrot.lane.b32.xlu1 %v833_v17, %s733_s10  ;;  %282 = vrot.lane.b32.xlu2 %v833_v17, %s731_s8 }
  0xd6   :  { %448 = vrot.lane.b32.xlu1 %v831_v16, %s735_s12  ;;  %331 = vrot.lane.b32.xlu2 %v833_v17, %s732_s9 }
  0xde   :  { %407 = vrot.lane.b32.xlu1 %v805_v14, %s733_s10  ;;  %368 = vrot.lane.b32.xlu2 %v833_v17, %s734_s11 }
  0xe0   :  { %v881_v25 = vpop.permute.xlu2 %239 }
  0xe6   :  { %411 = vrot.lane.b32.xlu2 %v831_v16, %s733_s10 }
  0xe8   :  { %v159_v30 = vpop.permute.xlu2 %158 }
  0xee   :  { %444 = vrot.lane.b32.xlu2 %v805_v14, %s735_s12 }
  0xf0   :  { %v908_v36 = vpop.permute.xlu2 %237 }
  0xf1   :  { %v248_v37 = vsel %vm245_vm3, %v908_v36, %v881_v25 }
  0xf2   :  { %v263_v38 = vsel %vm251_vm4, %v248_v37, 0.0  ;;  %vm1009_vm4 = vcmp.lt.s32.totalorder %v129_v7, 15 }
  0xf3   :  { %v271_v39 = vmul.f32 %v875_v24, %v263_v38 }
  0xf6   :  { %494 = vperm.xlu2 %665, %v486_v15  }
  0xf8   :  { %v203_v40 = vpop.permute.xlu1 %202  ;;  %v915_v41 = vpop.permute.xlu2 %278 }
  0xf9   :  { %v161_v42 = vpop.permute.xlu0 %160 }
  0xfa   :  { %v169_v44 = vsel %vm166_vm6, %v159_v30, %v161_v42 }
  0xfb   :  { %v184_v47 = vsel %vm172_vm7, %v169_v44, 0.0 }
  0xfc   :  { %v193_v52 = vmul.f32 %v863_v19, %v184_v47 }
 0x100   :  { %v930_v45 = vpop.permute.xlu1 %280  ;;  %v932_v46 = vpop.permute.xlu2 %442 }
 0x101   :  { %v289_v48 = vsel %vm286_vm8, %v915_v41, %v930_v45  ;;  %v201_v49 = vpop.permute.xlu0 %200 }
 0x102   :  { %v211_v50 = vsel %vm208_vm9, %v201_v49, %v203_v40  ;;  %v300_v54 = vsel %vm917_vm5, %v289_v48, 0.0 }
 0x103   :  { %v222_v51 = vsel %vm142_vm1, %v211_v50, 0.0  ;;  %v308_v56 = vmul.f32 %v884_v27, %v300_v54  ;;  %vm1001_vm1 = vcmp.lt.s32.totalorder %v131_v6, 15  ;;  %v128_v54 = vadd.s32 384, %v873_v23 }
 0x104   :  { %v230_v53 = vmul.f32 %v871_v22, %v222_v51  ;;  %vm252_vm7 = vmand %vm143_vm13, %vm1001_vm1 }
 0x106   :  { %v234_v55 = vadd.f32 %v230_v53, %v193_v52 }
 0x108   :  { %v275_v57 = vadd.f32 %v271_v39, %v234_v55  ;;  %v947_v58 = vpop.permute.xlu1 %327  ;;  %v949_v59 = vpop.permute.xlu2 %366 }
 0x109   :  { %v951_v60 = vpop.permute.xlu0 %405 }
 0x10a   :  { %v312_v62 = vadd.f32 %v308_v56, %v275_v57 }
 0x10c   :  { %v956_v0 = vadd.f32 %v320_v61, %v312_v62 }
 0x110   :  { %v959_v2 = vpop.permute.xlu1 %364  ;;  %v961_v4 = vpop.permute.xlu2 %204 }
 0x111   :  { %v963_v5 = vpop.permute.xlu0 %329  ;;  %v210_v31 = vsel %vm208_vm9, %v203_v40, %v961_v4 }
 0x118   :  { %v165_v13 = vpop.permute.xlu1 %164  ;;  %v207_v14 = vpop.permute.xlu2 %206 }
 0x119   :  { %v170_v18 = vsel %vm166_vm6, %v165_v13, %v159_v30  ;;  %v163_v21 = vpop.permute.xlu0 %162  ;;  %v212_v26 = vsel %vm208_vm9, %v207_v14, %v201_v49 }
 0x11a   :  { %v168_v28 = vsel %vm166_vm6, %v161_v42, %v163_v21  ;;  %v183_v30 = vsel %vm984_vm14, %v170_v18, 0.0  ;;  %v221_v39 = vsel %vm141_vm10, %v212_v26, 0.0  ;;  %v223_v42 = vsel %vm143_vm13, %v210_v31, 0.0  ;;  %vm250_vm14 = vmand %vm141_vm10, %vm1009_vm4 }
 0x11b   :  { %v185_v38 = vsel %vm173_vm15, %v168_v28, 0.0  ;;  %v192_v40 = vmul.f32 %v863_v19, %v183_v30  ;;  %v229_v48 = vmul.f32 %v871_v22, %v221_v39  ;;  %v231_v51 = vmul.f32 %v871_v22, %v223_v42 }
 0x11c   :  { %v194_v47 = vmul.f32 %v863_v19, %v185_v38  ;;  %vm335_vm10 = vcmp.lt.s32.totalorder %v873_v23, 127  ;;  %vm1272_vm13 = vcmp.lt.s32.totalorder %v966_v8, 15  ;;  %vm372_vm15 = vcmp.lt.s32.totalorder %v873_v23, 113 }
 0x11d   :  { %v233_v61 = vadd.f32 %v229_v48, %v192_v40  ;;  %v338_v7 = vsel %vm335_vm10, %v947_v58, %v963_v5  ;;  %v375_v26 = vsel %vm372_vm15, %v959_v2, %v949_v59  ;;  %v132_v28 = vand.u32 15, %v128_v54 }
 0x11e   :  { %v235_v57 = vadd.f32 %v231_v51, %v194_v47 }
 0x11f   :  { %vm1088_vm0 = vcmp.lt.s32.totalorder %v132_v28, 15 }
 0x120   :  { %v242_v49 = vpop.permute.xlu1 %241  ;;  %v244_v50 = vpop.permute.xlu2 %243 }
 0x121   :  { %v247_v52 = vsel %vm245_vm3, %v881_v25, %v242_v49  ;;  %v249_v53 = vsel %vm245_vm3, %v244_v50, %v908_v36  ;;  %v136_v25 = vshra.s32 %v128_v54, 4 }
 0x122   :  { %v264_v55 = vsel %vm252_vm7, %v247_v52, 0.0  ;;  %v262_v56 = vsel %vm250_vm14, %v249_v53, 0.0  ;;  %vm377_vm7 = vmand %vm1272_vm13, %vm975_vm12  ;;  %vm1067_vm14 = vcmp.ge.s32.totalorder %v132_v28, 1  ;;  %vm146_vm13 = vcmp.lt.s32.totalorder %v890_v32, 15 }
 0x123   :  { %v272_v62 = vmul.f32 %v875_v24, %v264_v55  ;;  %v270_v63 = vmul.f32 %v875_v24, %v262_v56  ;;  %v1058_v31 = vand.u32 15, %v136_v25  ;;  %v389_v39 = vsel %vm377_vm7, %v375_v26, 0.0 }
 0x124   :  { %v397_v52 = vmul.f32 %v869_v20, %v389_v39  ;;  %v167_v55 = vsel %vm166_vm6, %v163_v21, %v165_v13  ;;  %v209_v56 = vsel %vm208_vm9, %v961_v4, %v207_v14  ;;  %v246_v4 = vsel %vm245_vm3, %v242_v49, %v244_v50  ;;  %vm378_vm9 = vmand %vm146_vm13, %vm917_vm5 }
 0x125   :  { %v1036_v1 = vadd.f32 %v272_v62, %v235_v57  ;;  %v274_v3 = vadd.f32 %v270_v63, %v233_v61  ;;  %vm148_vm3 = vcmp.lt.s32.totalorder %v1058_v31, 15  ;;  %vm147_vm5 = vcmp.lt.s32.totalorder %v968_v9, 15 }
 0x128   :  { %v285_v36 = vpop.permute.xlu1 %284  ;;  %v283_v6 = vpop.permute.xlu2 %282 }
 0x129   :  { %v290_v12 = vsel %vm286_vm8, %v285_v36, %v915_v41  ;;  %v348_v41 = vsel %vm1009_vm4, %v338_v7, 0.0  ;;  %v288_v14 = vsel %vm286_vm8, %v930_v45, %v283_v6  ;;  %v287_v21 = vsel %vm286_vm8, %v283_v6, %v285_v36  ;;  %vm1144_vm8 = vmand %vm148_vm3, %vm1067_vm14 }
 0x12a   :  { %v299_v18 = vsel %vm975_vm12, %v290_v12, 0.0  ;;  %v356_v42 = vmul.f32 %v902_v35, %v348_v41  ;;  %vm144_vm12 = vcmp.ge.s32.totalorder %v1058_v31, 1  ;;  %v301_v45 = vsel %vm971_vm11, %v288_v14, 0.0 }
 0x12b   :  { %v307_v30 = vmul.f32 %v884_v27, %v299_v18  ;;  %vm1079_vm7 = vmand %vm144_vm12, %vm1067_vm14  ;;  %v224_v13 = vsel %vm144_vm12, %v209_v56, 0.0  ;;  %v302_v43 = vsel %vm1067_vm14, %v287_v21, 0.0  ;;  %v309_v26 = vmul.f32 %v884_v27, %v301_v45 }
 0x12c   :  { %v186_v62 = vsel %vm1079_vm7, %v167_v55, 0.0  ;;  %vm253_vm6 = vmand %vm144_vm12, %vm1088_vm0  ;;  %v232_v25 = vmul.f32 %v871_v22, %v224_v13  ;;  %v310_v28 = vmul.f32 %v884_v27, %v302_v43  ;;  %vm413_vm12 = vcmp.lt.s32.totalorder %v873_v23, 112  ;;  %v447_v27 = vpop.permute.xlu0 %446 }
 0x12d   :  { %v311_v38 = vadd.f32 %v307_v30, %v274_v3  ;;  %v195_v3 = vmul.f32 %v863_v19, %v186_v62  ;;  %v265_v7 = vsel %vm253_vm6, %v246_v4, 0.0  ;;  %v321_v56 = vmul.f32 %v888_v29, %v833_v17  ;;  %vm458_vm14 = vmand %vm148_vm3, %vm1088_vm0 }
 0x12e   :  { %v273_v12 = vmul.f32 %v875_v24, %v265_v7  ;;  %vm1225_vm7 = vmand %vm146_vm13, %vm893_vm2 }
 0x12f   :  { %v323_v47 = vadd.f32 %v319_v11, %v311_v38  ;;  %v236_v18 = vadd.f32 %v232_v25, %v195_v3 }
 0x130   :  { %v334_v48 = vpop.permute.xlu1 %333  ;;  %v332_v51 = vpop.permute.xlu2 %331 }
 0x131   :  { %v337_v53 = vsel %vm335_vm10, %v963_v5, %v332_v51  ;;  %v360_v54 = vadd.f32 %v356_v42, %v323_v47  ;;  %v336_v24 = vsel %vm335_vm10, %v332_v51, %v334_v48  ;;  %v277_v41 = vadd.f32 %v273_v12, %v236_v18 }
 0x132   :  { %v349_v61 = vsel %vm893_vm2, %v337_v53, 0.0  ;;  %v350_v42 = vsel %vm1001_vm1, %v336_v24, 0.0 }
 0x133   :  { %v1092_v5 = vadd.f32 %v397_v52, %v360_v54  ;;  %v357_v63 = vmul.f32 %v902_v35, %v349_v61  ;;  %v314_v10 = vadd.f32 %v310_v28, %v277_v41  ;;  %v322_v52 = vmul.f32 %v888_v29, %v831_v16 }
 0x134   :  { %v358_v16 = vmul.f32 %v902_v35, %v350_v42 }
 0x135   :  { %v361_v19 = vadd.f32 %v357_v63, %v956_v0  ;;  %v326_v13 = vadd.f32 %v322_v52, %v314_v10 }
 0x138   :  { %v371_v49 = vpop.permute.xlu1 %370  ;;  %v369_v50 = vpop.permute.xlu2 %368 }
 0x139   :  { %v374_v36 = vsel %vm372_vm15, %v949_v59, %v369_v50  ;;  %v339_v59 = vsel %vm335_vm10, %v334_v48, %v947_v58  ;;  %v376_v58 = vsel %vm372_vm15, %v371_v49, %v959_v2  ;;  %vm1156_vm10 = vmand %vm147_vm5, %vm971_vm11  ;;  %v373_v11 = vsel %vm372_vm15, %v369_v50, %v371_v49 }
 0x13a   :  { %v390_v6 = vsel %vm378_vm9, %v374_v36, 0.0  ;;  %v351_v39 = vsel %vm1088_vm0, %v339_v59, 0.0  ;;  %v313_v2 = vadd.f32 %v309_v26, %v1036_v1  ;;  %v392_v53 = vsel %vm1144_vm8, %v376_v58, 0.0  ;;  %v485_v1 = vld [vmem:[%s1269_s4] sm:$0xff]  ;;  %vm457_vm15 = vmand %vm147_vm5, %vm1001_vm1 }
 0x13b   :  { %v398_v22 = vmul.f32 %v869_v20, %v390_v6  ;;  %v391_v54 = vsel %vm1156_vm10, %v373_v11, 0.0  ;;  %v359_v55 = vmul.f32 %v902_v35, %v351_v39  ;;  %489 = vperm.xlu1 %664, %v485_v1   ;;  %v400_v14 = vmul.f32 %v869_v20, %v392_v53  ;;  %v484_v39 = vld [vmem:[%s1268_s3 + $0x8] sm:$0xff] }
 0x13c   :  { %v325_v4 = vadd.f32 %v321_v56, %v313_v2  ;;  %v399_v21 = vmul.f32 %v869_v20, %v391_v54  ;;  %vm450_vm11 = vcmp.lt.s32.totalorder %v873_v23, 111  ;;  %v473_v20 = vpop.permute.xlu0 %472  ;;  %vm1297_vm0 = vcmp.lt.s32.totalorder %v966_v8, 15 }
 0x13d   :  { %v1138_v30 = vadd.f32 %v398_v22, %v361_v19  ;;  %v363_v17 = vadd.f32 %v359_v55, %v326_v13  ;;  %v483_v19 = vld [vmem:[%s1268_s3] sm:$0xff]  ;;  %vm1217_vm1 = vmand %vm1297_vm0, %vm1009_vm4  ;;  %vm1302_vm4 = vcmask 64512   ;;  %s737_s3 = smov [#allocation5]  }
 0x13e   :  { %v362_v29 = vadd.f32 %v358_v16, %v325_v4  ;;  %vm1303_vm6 = vmmov %vm1302_vm4  ;;  %s607_s20 = sshll.u32 %s737_s3, 4  ;;  %s608_s20 = int_to_ptr.vmem [resolvable:$true] %s607_s20 }
 0x13f   :  { %v404_v7 = vadd.f32 %v400_v14, %v363_v17  ;;  %vm1304_vm2 = vmmov %vm1297_vm0 }
 0x140   :  { %v410_v40 = vpop.permute.xlu1 %409  ;;  %v412_v47 = vpop.permute.xlu2 %411  ;;  %v403_v37 = vadd.f32 %v399_v21, %v362_v29  ;;  %vm1305_vm9 = vmmov %vm1302_vm4 }
 0x141   :  { %v414_v48 = vsel %vm413_vm12, %v410_v40, %v412_v47  ;;  %v417_v51 = vsel %vm413_vm12, %v412_v47, %v951_v60 }
 0x142   :  { %v428_v61 = vsel %vm147_vm5, %v414_v48, 0.0  ;;  %v429_v62 = vsel %vm148_vm3, %v417_v51, 0.0  ;;  %vm1306_vm3 = vmmov %vm1302_vm4 }
 0x143   :  { %v436_v35 = vmul.f32 %v899_v34, %v428_v61  ;;  %v437_v63 = vmul.f32 %v899_v34, %v429_v62  ;;  %vm1308_vm5 = vmmov %vm1306_vm3 }
 0x144   :  { %vm1309_vm8 = vmmov %vm1306_vm3 }
 0x145   :  { %v440_v45 = vadd.f32 %v436_v35, %v403_v37  ;;  %v441_v43 = vadd.f32 %v437_v63, %v404_v7 }
 0x148   :  { %v449_v3 = vpop.permute.xlu1 %448  ;;  %v445_v6 = vpop.permute.xlu2 %444 }
 0x149   :  { %v451_v25 = vsel %vm450_vm11, %v447_v27, %v449_v3  ;;  %v454_v9 = vsel %vm450_vm11, %v449_v3, %v932_v46  ;;  %v452_v26 = vsel %vm450_vm11, %v445_v6, %v447_v27  ;;  %v453_v44 = vsel %vm450_vm11, %v932_v46, %v445_v6 }
 0x14a   :  { %v469_v49 = vsel %vm457_vm15, %v451_v25, 0.0  ;;  %v470_v50 = vsel %vm458_vm14, %v454_v9, 0.0  ;;  %v467_v24 = vsel %vm1217_vm1, %v453_v44, 0.0  ;;  %v468_v46 = vsel %vm1225_vm7, %v452_v26, 0.0 }
 0x14b   :  { %v477_v36 = vmul.f32 %v473_v20, %v469_v49  ;;  %v478_v57 = vmul.f32 %v473_v20, %v470_v50  ;;  %v475_v23 = vmul.f32 %v473_v20, %v467_v24  ;;  %v476_v11 = vmul.f32 %v473_v20, %v468_v46 }
 0x14d   :  { %v481_v31 = vadd.f32 %v477_v36, %v440_v45  ;;  %v482_v12 = vadd.f32 %v478_v57, %v441_v43 }
 0x14f   :  { %564 = vmatpush.msrb.mxu2 %v481_v31  ;;  %587 = vmatpush.msrb.mxu3 %v482_v12 }
 0x150   :  { %v408_v28 = vpop.permute.xlu1 %407  ;;  %630 = vmatmul.msk.f32.vlgmr.msrb.gmra.mxu2 %vm1302_vm4, %v483_v19  ;;  %632 = vmatmul.msk.f32.vlgmr.msrb.gmra.mxu3 %vm1303_vm6, %v483_v19  ;;  %v495_v51 = vpop.permute.xlu2 %494 }
 0x151   :  { %v415_v33 = vsel %vm413_vm12, %v408_v28, %v410_v40  ;;  %v416_v59 = vsel %vm413_vm12, %v951_v60, %v408_v28  ;;  %vm1310_vm12 = vmmov %vm1306_vm3 }
 0x152   :  { %v426_v0 = vsel %vm1304_vm2, %v416_v59, 0.0  ;;  %v427_v27 = vsel %vm146_vm13, %v415_v33, 0.0  ;;  %vm1307_vm13 = vmmov %vm1306_vm3 }
 0x153   :  { %v434_v41 = vmul.f32 %v899_v34, %v426_v0  ;;  %v435_v58 = vmul.f32 %v899_v34, %v427_v27 }
 0x155   :  { %v438_v38 = vadd.f32 %v434_v41, %v1092_v5  ;;  %v439_v60 = vadd.f32 %v435_v58, %v1138_v30 }
 0x157   :  { %v479_v42 = vadd.f32 %v475_v23, %v438_v38  ;;  %v480_v8 = vadd.f32 %v476_v11, %v439_v60 }
 0x158   :  { %631 = vmatmul.msk.f32.gmra.mxu2 %vm1305_vm9, %v484_v39  ;;  %633 = vmatmul.msk.f32.gmra.mxu3 %vm1306_vm3, %v484_v39 }
 0x159   :  { %518 = vmatpush.msrb.mxu0 %v479_v42  ;;  %541 = vmatpush.msrb.mxu1 %v480_v8 }
 0x15a   :  { %626 = vmatmul.msk.f32.vlgmr.msrb.gmra.mxu0 %vm1307_vm13, %v483_v19  ;;  %628 = vmatmul.msk.f32.vlgmr.msrb.gmra.mxu1 %vm1308_vm5, %v483_v19 }
 0x162   :  { %627 = vmatmul.msk.f32.gmra.mxu0 %vm1309_vm8, %v484_v39  ;;  %629 = vmatmul.msk.f32.gmra.mxu1 %vm1310_vm12, %v484_v39 }
 0x1ad   :  { %v490_v32 = vpop.permute.xlu1 %489 }
 0x1d3   :  { %v566_v34 = vpop.f32.mrf.mxu2  ;;  %v589_v5 = vpop.f32.mrf.mxu3 }
 0x1d4   :  { %v567_v30 = vadd.f32 %v566_v34, %v490_v32  ;;  %v590_v40 = vadd.f32 %v589_v5, %v490_v32 }
 0x1d6   :  { %597 = vst [vmem:[#allocation5 + $0x10] sm:$0xff] %v567_v30 }
 0x1d7   :  { %v520_v47 = vpop.f32.mrf.mxu0  ;;  %v543_v2 = vpop.f32.mrf.mxu1  ;;  %598 = vst [vmem:[#allocation5 + $0x18] sm:$0xff] %v590_v40 }
 0x1d8   :  { %v521_v10 = vadd.f32 %v520_v47, %v490_v32  ;;  %v544_v48 = vadd.f32 %v543_v2, %v490_v32 }
 0x1da   :  { %595 = vst [vmem:[#allocation5] sm:$0xff] %v521_v10 }
 0x1db   :  { %596 = vst [vmem:[#allocation5 + $0x8] sm:$0xff] %v544_v48  ;;  %v569_v52 = vpop.f32.mrf.mxu2  ;;  %v592_v53 = vpop.f32.mrf.mxu3 }
 0x1dc   :  { %v570_v54 = vadd.f32 %v569_v52, %v495_v51  ;;  %v593_v1 = vadd.f32 %v592_v53, %v495_v51 }
 0x1de   :  { %601 = vst [vmem:[#allocation5 + $0x30] sm:$0xff] %v570_v54 }
 0x1df   :  { %v546_v15 = vpop.f32.mrf.mxu1  ;;  %602 = vst [vmem:[#allocation5 + $0x38] sm:$0xff] %v593_v1  ;;  %v523_v55 = vpop.f32.mrf.mxu0 }
 0x1e0   :  { %v547_v56 = vadd.f32 %v546_v15, %v495_v51  ;;  %v524_v16 = vadd.f32 %v523_v55, %v495_v51 }
 0x1e2   :  { %600 = vst [vmem:[#allocation5 + $0x28] sm:$0xff] %v547_v56 }
 0x1e3   :  { %599 = vst [vmem:[#allocation5 + $0x20] sm:$0xff] %v524_v16 }
 0x1e4   :  { %615 = dma.vmem_to_hbm [thread:$0]  %s608_s20, 1024, %s610_s23, [#allocation4], %s738_s24, %s738_s24, %s739_s2  }
 0x1e5   :  { %717 = dma.done.wait [#allocation4], 1024  }
 0x1e6   :  { %718 = vsyncadd [#allocation4], 4294966272 }
 0x1e7   :  { %620 = vsyncpa [#allocation3], 1 }
 0x1e8   :  { %621 = vsyncpa [#allocation4], 1 }

</bundles_post_ra>
